<compile_context>
chip_gen: v5e
topology: v5e:2x2
jax: 0.10.0
libtpu: 0.0.40
codegen_flags: <defaults>
</compile_context>

<pallas_src>
import functools
import math

import jax
import jax.numpy as jnp
from jax import lax
from jax.experimental import pallas as pl
from jax.experimental.pallas import tpu as pltpu


def _round_up(x: int, m: int) -> int:
    return ((x + m - 1) // m) * m


# ---------------------------------------------------------------------------
# Stage 1: row-wise L2 normalization (+ folded scale), f32 in -> bf16 out.
# ---------------------------------------------------------------------------
def _l2_normalize_kernel(x_ref, o_ref, *, scale):
    x = x_ref[...].astype(jnp.float32)
    ssq = jnp.sum(x * x, axis=-1, keepdims=True)
    # rsqrt lives on the EUP (its own VLIW slot). Guard ssq == 0 so rows the
    # wrapper zero-padded stay exactly zero instead of becoming NaN/inf.
    inv = jnp.where(ssq > 0.0, lax.rsqrt(ssq), 0.0) * scale
    o_ref[...] = (x * inv).astype(o_ref.dtype)


def _l2_normalize(x: jax.Array, row_tile: int, scale: float) -> jax.Array:
    rows, d = x.shape
    assert rows % row_tile == 0
    kernel = functools.partial(_l2_normalize_kernel, scale=scale)
    return pl.pallas_call(
        kernel,
        out_shape=jax.ShapeDtypeStruct((rows, d), jnp.bfloat16),
        grid=(rows // row_tile,),
        in_specs=[pl.BlockSpec((row_tile, d), lambda r: (r, 0))],
        out_specs=pl.BlockSpec((row_tile, d), lambda r: (r, 0)),
        compiler_params=pltpu.CompilerParams(
            dimension_semantics=("parallel",),
            vmem_limit_bytes=48 * 1024 * 1024,
        ),
        cost_estimate=pl.CostEstimate(
            flops=3 * rows * d,
            transcendentals=rows,
            bytes_accessed=4 * rows * d + 2 * rows * d,
        ),
    )(x)


# ---------------------------------------------------------------------------
# Stage 2: tiled scaled logits  out[i, j] = sum_d img_n[i, d] * txt_n[j, d]
# (the 100x scale is already folded into img_n, so there is no epilogue work).
# ---------------------------------------------------------------------------
def _logits_kernel(img_ref, txt_ref, out_ref):
    # Contract the last axis of BOTH operands: feeds the MXU with both tiles in
    # their natural [rows, d] lane-major layout (no transpose through the XLU).
    out_ref[...] = lax.dot_general(
        img_ref[...],
        txt_ref[...],
        dimension_numbers=(((1,), (1,)), ((), ())),
        preferred_element_type=jnp.float32,
    )


def clip_decoder(image_features: jax.Array, text_features: jax.Array) -> jax.Array:
    """Pallas implementation of ClipDecoder.forward.

    image_features: [n_image, d]
    text_features:  [n_text,  d]
    returns logits_per_image: [n_image, n_text] (float32)
    """
    n_image, d = image_features.shape
    n_text, d2 = text_features.shape
    assert d == d2, "feature dims must match"

    # TM: multiple of 8 (128 fills the MXU M dim); TN: multiple of 128 so the
    # output tile is lane-dense (full unmasked vector stores). Feature dim d is
    # kept whole in every block (CLIP d = 512/768/1024 fits easily). With bf16
    # inputs + f32 output and double-buffering this is only a few MiB of VMEM,
    # well inside v7x's 64 MiB.
    tm = min(128, _round_up(n_image, 8))
    tn = min(512, _round_up(n_text, 128))
    m_pad = _round_up(n_image, tm)
    n_pad = _round_up(n_text, tn)

    img = image_features
    txt = text_features
    if m_pad != n_image:
        img = jnp.pad(img, ((0, m_pad - n_image), (0, 0)))
    if n_pad != n_text:
        txt = jnp.pad(txt, ((0, n_pad - n_text), (0, 0)))

    # Normalize each operand exactly once (not once per grid step); fold the
    # 100x logit scale into the image rows.
    img_n = _l2_normalize(img, tm, scale=100.0)
    txt_n = _l2_normalize(txt, tn, scale=1.0)

    logits = pl.pallas_call(
        _logits_kernel,
        out_shape=jax.ShapeDtypeStruct((m_pad, n_pad), jnp.float32),
        grid=(m_pad // tm, n_pad // tn),  # j (text) is the inner grid axis
        in_specs=[
            pl.BlockSpec((tm, d), lambda i, j: (i, 0)),
            pl.BlockSpec((tn, d), lambda i, j: (j, 0)),
        ],
        out_specs=pl.BlockSpec((tm, tn), lambda i, j: (i, j)),
        compiler_params=pltpu.CompilerParams(
            dimension_semantics=("parallel", "parallel"),
            vmem_limit_bytes=48 * 1024 * 1024,
        ),
        cost_estimate=pl.CostEstimate(
            flops=2 * m_pad * n_pad * d,
            transcendentals=0,
            bytes_accessed=2 * (m_pad * d + n_pad * d) + 4 * m_pad * n_pad,
        ),
    )(img_n, txt_n)

    if (m_pad, n_pad) != (n_image, n_text):
        logits = logits[:n_image, :n_text]
    return logits


def clip_decoder_ref(image_features, text_features):
    """Pure-JAX reference mirroring the PyTorch module."""
    img = image_features / jnp.linalg.norm(image_features, axis=-1, keepdims=True)
    txt = text_features / jnp.linalg.norm(text_features, axis=-1, keepdims=True)
    return 100.0 * img @ txt.T


if __name__ == "__main__":
    # Deterministic parameter from __init__ (unused in forward, kept for parity).
    logit_scale = jnp.array(math.log(1.0 / 0.07), dtype=jnp.float32)  # noqa: F841

    key = jax.random.PRNGKey(0)
    k_img, k_txt = jax.random.split(key)

    n_image, n_text, d = 8, 16, 32
    image_features = jax.random.normal(k_img, (n_image, d), dtype=jnp.float32)
    text_features = jax.random.normal(k_txt, (n_text, d), dtype=jnp.float32)

    logits = clip_decoder(image_features, text_features)
    jax.block_until_ready(logits)

    ref = clip_decoder_ref(image_features, text_features)
    assert logits.shape == (n_image, n_text)
    # bf16 MXU operands => ~1e-2-level relative error on logits (|logits| <= 100).
    assert jnp.allclose(logits, ref, atol=0.5, rtol=2e-2), "mismatch vs reference"

    print("KERNEL_OK")
</pallas_src>

<mosaic_0001>
module attributes {stable_mosaic.version = 11 : i64} {
  func.func @_l2_normalize_kernel(%arg0: i32, %arg1: memref<8x32xf32, #tpu.memory_space<vmem>>, %arg2: memref<8x32xbf16, #tpu.memory_space<vmem>>) attributes {dimension_semantics = [#tpu.dimension_semantics<parallel>], iteration_bounds = array<i64: 1>, scalar_prefetch = 0 : i64, scratch_operands = 0 : i64, tpu.core_type = #tpu.core_type<tc>, window_params = [{transform_indices = @transform_0, window_bounds = array<i64: 8, 32>}, {transform_indices = @transform_1, window_bounds = array<i64: 8, 32>}]} {
    %c0 = arith.constant 0 : index
    %c0_0 = arith.constant 0 : index
    %0 = vector.load %arg1[%c0, %c0_0] : memref<8x32xf32, #tpu.memory_space<vmem>>, vector<8x32xf32>
    %1 = arith.mulf %0, %0 : vector<8x32xf32>
    %cst = arith.constant dense<0.000000e+00> : vector<8xf32>
    %2 = vector.multi_reduction <add>, %1, %cst [1] : vector<8x32xf32> to vector<8xf32>
    %3 = vector.shape_cast %2 : vector<8xf32> to vector<8x1xf32>
    %cst_1 = arith.constant 0.000000e+00 : f32
    %4 = vector.broadcast %cst_1 : f32 to vector<8x1xf32>
    %5 = arith.cmpf ogt, %3, %4 : vector<8x1xf32>
    %6 = math.rsqrt %3 : vector<8x1xf32>
    %cst_2 = arith.constant 0.000000e+00 : f32
    %7 = vector.broadcast %cst_2 : f32 to vector<8x1xf32>
    %8 = arith.select %5, %6, %7 : vector<8x1xi1>, vector<8x1xf32>
    %cst_3 = arith.constant 1.000000e+02 : f32
    %9 = vector.broadcast %cst_3 : f32 to vector<8x1xf32>
    %10 = arith.mulf %8, %9 : vector<8x1xf32>
    %11 = vector.broadcast %10 : vector<8x1xf32> to vector<8x32xf32>
    %12 = arith.mulf %0, %11 : vector<8x32xf32>
    %13 = arith.truncf %12 : vector<8x32xf32> to vector<8x32xbf16>
    %c0_4 = arith.constant 0 : index
    %c0_5 = arith.constant 0 : index
    %14 = vector.load %arg2[%c0_4, %c0_5] : memref<8x32xbf16, #tpu.memory_space<vmem>>, vector<8x32xbf16>
    tpu.vector_store %arg2[%c0_4, %c0_5], %13 {strides = array<i32>} : memref<8x32xbf16, #tpu.memory_space<vmem>>, vector<8x32xbf16>,
    return
  }
  func.func @transform_0(%arg0: i32) -> (i32, i32) {
    %c0_i32 = arith.constant 0 : i32
    %c0_i32_0 = arith.constant 0 : i32
    return %arg0, %c0_i32 : i32, i32
  }
  func.func @transform_1(%arg0: i32) -> (i32, i32) {
    %c0_i32 = arith.constant 0 : i32
    %c0_i32_0 = arith.constant 0 : i32
    return %arg0, %c0_i32 : i32, i32
  }
}

</mosaic_0001>

<bundles_post_ra>
// kernel: tpu_custom_call.1
= control target key start
LH: loop header
LB: loop body
LE: loop exit
PB: predicated region body
PF: predicated region fallthrough
CT: control target
= control target key end

     0   :  { %6 = vsyncpa [#allocation3], 0  ;;  %s137_s0 = inlined_call_operand.hbm [shape: f32[8,32], index: 0, kind: input, shape index: {}]   ;;  %s138_s1 = inlined_call_operand.hbm [shape: bf16[8,32], index: 1, kind: output, shape index: {}]  }
   0x1   :  { %7 = vsyncpa [#allocation4], 0  ;;  %s13_s8 = sshll.u32 %s137_s0, 4  ;;  %s119_s9 = smov [#allocation2]   ;;  %s14_s8 = int_to_ptr.hbm [resolvable:$true] %s13_s8 }
   0x2   :  { %s15_s10 = sshll.u32 %s119_s9, 4  ;;  %s16_s10 = int_to_ptr.vmem [resolvable:$true] %s15_s10 }
   0x3   :  { %18 = dma.hbm_to_vmem [thread:$0]  %s14_s8, 128, %s16_s10, [#allocation3]  }
   0x4   :  { %115 = dma.done.wait [#allocation3], 128  }
   0x5   :  { %116 = vsyncadd [#allocation3], 4294967168  ;;  %v23_v0 = vld [vmem:[#allocation2] sm:$0xff]  ;;  %vm25_vm0 = vcmask 261120   ;;  %s120_s0 = smov [#allocation5]   ;;  %s53_s14 = sshll.u32 %s138_s1, 4  ;;  %s54_s14 = int_to_ptr.hbm [resolvable:$true] %s53_s14 }
   0x6   :  { %v24_v1 = vmul.f32 %v23_v0, %v23_v0  ;;  %s51_s11 = sshll.u32 %s120_s0, 4  ;;  %vm44_vm5 = vcmask 257024   ;;  %s52_s11 = int_to_ptr.vmem [resolvable:$true] %s51_s11 }
   0x8   :  { %v26_v2 = vsel %vm25_vm0, %v24_v1, 0.0 }
   0x9   :  { %27 = vadd.xlane.f32.xlu0 %v26_v2 }
  0x7c   :  { %v28_v3 = vpop.xlane.xlu0 %27 }
  0x7d   :  { %65 = vrsqrt.f32 %v28_v3  ;;  %vm36_vm2 = vweird.f32 %v28_v3  ;;  %vm29_vm4 = vcmp.gt.f32.partialorder %v28_v3, 0.0 }
  0x83   :  { %v66_v4 = vpop.eup %65 }
  0x84   :  { %v31_v5 = vmul.f32 %v66_v4, %v28_v3  ;;  %vm37_vm1 = vweird.f32 %v66_v4 }
  0x85   :  { %vm38_vm3 = vmor %vm36_vm2, %vm37_vm1 }
  0x86   :  { %v32_v6 = vmul.f32 %v66_v4, %v31_v5 }
  0x88   :  { %v33_v7 = vmul.f32 0.5, %v32_v6 }
  0x8a   :  { %v34_v8 = vsub.f32 1.5, %v33_v7 }
  0x8c   :  { %v35_v9 = vmul.f32 %v66_v4, %v34_v8 }
  0x8e   :  { %v39_v10 = vsel %vm38_vm3, %v66_v4, %v35_v9 }
  0x8f   :  { %v40_v11 = vsel %vm29_vm4, %v39_v10, 0.0 }
  0x90   :  { %v41_v12 = vmul.f32 100.0, %v40_v11 }
  0x92   :  { %v42_v13 = vmul.f32 %v41_v12, %v23_v0 }
  0x94   :  { %v43_v14 = vpack.c.bf16 %v42_v13, %v42_v13 }
  0x96   :  { %45 = vst.msk [vmem:[#allocation5] sm:$0xf] %vm44_vm5, %v43_v14 }
  0x97   :  { %56 = dma.vmem_to_hbm [thread:$0]  %s52_s11, 64, %s54_s14, [#allocation4]  }
  0x98   :  { %117 = dma.done.wait [#allocation4], 64  }
  0x99   :  { %118 = vsyncadd [#allocation4], 4294967232 }
  0x9a   :  { %61 = vsyncpa [#allocation3], 1 }
  0x9b   :  { %62 = vsyncpa [#allocation4], 1 }

</bundles_post_ra>
